<compile_context>
chip_gen: v5e
topology: v5e:2x2
jax: 0.10.0
libtpu: 0.0.40
codegen_flags: <defaults>
</compile_context>

<pallas_src>
import jax
import jax.numpy as jnp
from jax.experimental import pallas as pl
from jax.experimental.pallas import tpu as pltpu

C = 3
LANE = 128
TRANS = [[0.7, 0.25, 4.5],
         [1.5, 0.125, 2.0],
         [3.0, 0.3, 0.5]]
_TRANS_FLAT = [TRANS[i][j] for i in range(3) for j in range(3)]


def _ce_penalty_kernel(x_ref, t_ref, out_ref, acc_ref):
    """x_ref/t_ref: (C, tile_rows, 128); out_ref: (1, 128); acc_ref: (tile_rows, 128)."""
    t_idx = pl.program_id(1)

    @pl.when(t_idx == 0)
    def _():
        acc_ref[...] = jnp.zeros_like(acc_ref)

    # Per-class lane-dense slabs, cast to f32 on load (keeps bf16 in HBM cheap).
    x0 = x_ref[0].astype(jnp.float32)
    x1 = x_ref[1].astype(jnp.float32)
    x2 = x_ref[2].astype(jnp.float32)
    t0 = t_ref[0].astype(jnp.float32)
    t1 = t_ref[1].astype(jnp.float32)
    t2 = t_ref[2].astype(jnp.float32)

    # log-softmax over the 3 classes, unrolled (everything is (tile_rows, 128)).
    mx = jnp.maximum(jnp.maximum(x0, x1), x2)
    z0, z1, z2 = x0 - mx, x1 - mx, x2 - mx
    lse = jnp.log(jnp.exp(z0) + jnp.exp(z1) + jnp.exp(z2))
    # Exact CE (no assumption that targets sum to 1):
    #   -sum_c t_c * (z_c - lse) = (t0+t1+t2)*lse - sum_c t_c*z_c
    loss_ce = (t0 + t1 + t2) * lse - (t0 * z0 + t1 * z1 + t2 * z2)

    # argmax over 3 classes (ties -> lowest index, matching torch.argmax).
    pred = jnp.where(x0 >= x1,
                     jnp.where(x0 >= x2, 0, 2),
                     jnp.where(x1 >= x2, 1, 2)).astype(jnp.int32)
    label = jnp.where(t0 >= t1,
                      jnp.where(t0 >= t2, 0, 2),
                      jnp.where(t1 >= t2, 1, 2)).astype(jnp.int32)

    # penalty = TRANS[label, pred] via a single code index and 8 selects.
    code = label * 3 + pred
    penalty = jnp.full_like(loss_ce, jnp.float32(_TRANS_FLAT[8]))
    for k in range(7, -1, -1):
        penalty = jnp.where(code == k, jnp.float32(_TRANS_FLAT[k]), penalty)

    # Lane/sublane-shaped running sum: pure VPU add, no per-step XLU reduce.
    acc_ref[...] += loss_ce * penalty

    @pl.when(t_idx == pl.num_programs(1) - 1)
    def _():
        # One sublane (XLU) reduce per sample; cross-lane finish happens in
        # the wrapper on a tiny (N, 1, 128) array.
        out_ref[...] = jnp.sum(acc_ref[...], axis=0, keepdims=True)


def ce_loss_with_penalty(x, target, *, max_tile_elems=32768):
    """x, target: arrays of shape (N, 3, H, W). Returns scalar f32 loss."""
    n, c, h, w = x.shape
    assert c == C, "CELossWithPenalty is defined for 3 classes"
    assert max_tile_elems % (8 * LANE) == 0
    hw = h * w

    # Tile selection: one big lane-dense block per sample if it fits, else
    # 32K-element tiles (double-buffered footprint ~1.6 MiB -> fits every
    # generation's default scoped VMEM, including v7x's 64 MiB physical).
    hw128 = -(-hw // LANE) * LANE
    tile_elems = hw128 if hw128 <= max_tile_elems else max_tile_elems
    hw_pad = -(-hw // tile_elems) * tile_elems

    # Free metadata reshape: NCHW is already class-major & contiguous per sample.
    x3 = x.reshape(n, c, hw)
    t3 = target.reshape(n, c, hw)
    if hw_pad != hw:
        # Zero-pad invariant: padded target columns are all-zero, so their CE
        # contribution is exactly 0 -> no validity mask needed in the kernel.
        pad = ((0, 0), (0, 0), (0, hw_pad - hw))
        x3 = jnp.pad(x3, pad)
        t3 = jnp.pad(t3, pad)

    rows = hw_pad // LANE
    tile_rows = tile_elems // LANE
    grid_hw = rows // tile_rows

    x4 = x3.reshape(n, c, rows, LANE)
    t4 = t3.reshape(n, c, rows, LANE)

    in_spec = pl.BlockSpec((None, C, tile_rows, LANE), lambda b, t: (b, 0, t, 0))
    partials = pl.pallas_call(
        _ce_penalty_kernel,
        out_shape=jax.ShapeDtypeStruct((n, 1, LANE), jnp.float32),
        grid_spec=pltpu.PrefetchScalarGridSpec(
            num_scalar_prefetch=0,
            grid=(n, grid_hw),
            in_specs=[in_spec, in_spec],
            out_specs=pl.BlockSpec((None, 1, LANE), lambda b, t: (b, 0, 0)),
            scratch_shapes=[pltpu.VMEM((tile_rows, LANE), jnp.float32)],
        ),
        compiler_params=pltpu.CompilerParams(
            dimension_semantics=("parallel", "arbitrary")),
    )(x4, t4)

    # Tiny cross-lane finish (N*128 f32) + mean over the true element count.
    return jnp.sum(partials) / jnp.float32(n * hw)


def _reference(x, target):
    logsm = jax.nn.log_softmax(x.astype(jnp.float32), axis=1)
    loss_ce = -jnp.sum(target.astype(jnp.float32) * logsm, axis=1)
    pred = jnp.argmax(x, axis=1)
    label = jnp.argmax(target, axis=1)
    trans = jnp.array(TRANS, jnp.float32)
    penalty = trans[label, pred]
    return jnp.mean(loss_ce * penalty)


if __name__ == "__main__":
    key = jax.random.PRNGKey(0)
    kx, kt = jax.random.split(key)

    N, H, W = 2, 16, 16
    x = jax.random.normal(kx, (N, C, H, W), dtype=jnp.float32)
    # Soft (probability) targets, same shape as input — matches the
    # nn.CrossEntropyLoss "class probabilities" calling convention used here.
    target = jax.nn.softmax(
        jax.random.normal(kt, (N, C, H, W), dtype=jnp.float32) * 2.0, axis=1)

    out = ce_loss_with_penalty(x, target)
    out = jax.block_until_ready(out)

    ref = _reference(x, target)
    assert jnp.allclose(out, ref, rtol=1e-5, atol=1e-5), (out, ref)

    print("KERNEL_OK")
</pallas_src>

<mosaic_0001>
module attributes {stable_mosaic.version = 11 : i64} {
  func.func @_ce_penalty_kernel(%arg0: i32, %arg1: i32, %arg2: memref<1x3x2x128xf32, #tpu.memory_space<vmem>>, %arg3: memref<1x3x2x128xf32, #tpu.memory_space<vmem>>, %arg4: memref<1x1x128xf32, #tpu.memory_space<vmem>>, %arg5: memref<2x128xf32, #tpu.memory_space<vmem>>) attributes {dimension_semantics = [#tpu.dimension_semantics<parallel>, #tpu.dimension_semantics<arbitrary>], iteration_bounds = array<i64: 2, 1>, scalar_prefetch = 0 : i64, scratch_operands = 1 : i64, tpu.core_type = #tpu.core_type<tc>, window_params = [{transform_indices = @transform_0, window_bounds = array<i64: 1, 3, 2, 128>}, {transform_indices = @transform_1, window_bounds = array<i64: 1, 3, 2, 128>}, {transform_indices = @transform_2, window_bounds = array<i64: 1, 1, 128>}]} {
    %c0_i32 = arith.constant 0 : i32
    %0 = arith.cmpi eq, %arg1, %c0_i32 : i32
    %1 = arith.extui %0 : i1 to i32
    %c0_i32_0 = arith.constant 0 : i32
    %2 = arith.cmpi ne, %1, %c0_i32_0 : i32
    scf.if %2 {
      %cst_46 = arith.constant 0.000000e+00 : f32
      %98 = vector.broadcast %cst_46 : f32 to vector<2x128xf32>
      %c0_47 = arith.constant 0 : index
      %c0_48 = arith.constant 0 : index
      %99 = vector.load %arg5[%c0_47, %c0_48] : memref<2x128xf32, #tpu.memory_space<vmem>>, vector<2x128xf32>
      tpu.vector_store %arg5[%c0_47, %c0_48], %98 {strides = array<i32>} : memref<2x128xf32, #tpu.memory_space<vmem>>, vector<2x128xf32>,
    } else {
    }
    %c0 = arith.constant 0 : index
    %c0_1 = arith.constant 0 : index
    %c0_2 = arith.constant 0 : index
    %c0_3 = arith.constant 0 : index
    %3 = vector.load %arg2[%c0, %c0_1, %c0_2, %c0_3] : memref<1x3x2x128xf32, #tpu.memory_space<vmem>>, vector<1x1x2x128xf32>
    %4 = vector.shape_cast %3 : vector<1x1x2x128xf32> to vector<2x128xf32>
    %c0_4 = arith.constant 0 : index
    %c1 = arith.constant 1 : index
    %c0_5 = arith.constant 0 : index
    %c0_6 = arith.constant 0 : index
    %5 = vector.load %arg2[%c0_4, %c1, %c0_5, %c0_6] : memref<1x3x2x128xf32, #tpu.memory_space<vmem>>, vector<1x1x2x128xf32>
    %6 = vector.shape_cast %5 : vector<1x1x2x128xf32> to vector<2x128xf32>
    %c0_7 = arith.constant 0 : index
    %c2 = arith.constant 2 : index
    %c0_8 = arith.constant 0 : index
    %c0_9 = arith.constant 0 : index
    %7 = vector.load %arg2[%c0_7, %c2, %c0_8, %c0_9] : memref<1x3x2x128xf32, #tpu.memory_space<vmem>>, vector<1x1x2x128xf32>
    %8 = vector.shape_cast %7 : vector<1x1x2x128xf32> to vector<2x128xf32>
    %c0_10 = arith.constant 0 : index
    %c0_11 = arith.constant 0 : index
    %c0_12 = arith.constant 0 : index
    %c0_13 = arith.constant 0 : index
    %9 = vector.load %arg3[%c0_10, %c0_11, %c0_12, %c0_13] : memref<1x3x2x128xf32, #tpu.memory_space<vmem>>, vector<1x1x2x128xf32>
    %10 = vector.shape_cast %9 : vector<1x1x2x128xf32> to vector<2x128xf32>
    %c0_14 = arith.constant 0 : index
    %c1_15 = arith.constant 1 : index
    %c0_16 = arith.constant 0 : index
    %c0_17 = arith.constant 0 : index
    %11 = vector.load %arg3[%c0_14, %c1_15, %c0_16, %c0_17] : memref<1x3x2x128xf32, #tpu.memory_space<vmem>>, vector<1x1x2x128xf32>
    %12 = vector.shape_cast %11 : vector<1x1x2x128xf32> to vector<2x128xf32>
    %c0_18 = arith.constant 0 : index
    %c2_19 = arith.constant 2 : index
    %c0_20 = arith.constant 0 : index
    %c0_21 = arith.constant 0 : index
    %13 = vector.load %arg3[%c0_18, %c2_19, %c0_20, %c0_21] : memref<1x3x2x128xf32, #tpu.memory_space<vmem>>, vector<1x1x2x128xf32>
    %14 = vector.shape_cast %13 : vector<1x1x2x128xf32> to vector<2x128xf32>
    %15 = arith.maximumf %4, %6 : vector<2x128xf32>
    %16 = arith.maximumf %15, %8 : vector<2x128xf32>
    %17 = arith.subf %4, %16 : vector<2x128xf32>
    %18 = arith.subf %6, %16 : vector<2x128xf32>
    %19 = arith.subf %8, %16 : vector<2x128xf32>
    %20 = math.exp %17 : vector<2x128xf32>
    %21 = math.exp %18 : vector<2x128xf32>
    %22 = arith.addf %20, %21 : vector<2x128xf32>
    %23 = math.exp %19 : vector<2x128xf32>
    %24 = arith.addf %22, %23 : vector<2x128xf32>
    %25 = math.log %24 : vector<2x128xf32>
    %26 = arith.addf %10, %12 : vector<2x128xf32>
    %27 = arith.addf %26, %14 : vector<2x128xf32>
    %28 = arith.mulf %27, %25 : vector<2x128xf32>
    %29 = arith.mulf %10, %17 : vector<2x128xf32>
    %30 = arith.mulf %12, %18 : vector<2x128xf32>
    %31 = arith.addf %29, %30 : vector<2x128xf32>
    %32 = arith.mulf %14, %19 : vector<2x128xf32>
    %33 = arith.addf %31, %32 : vector<2x128xf32>
    %34 = arith.subf %28, %33 : vector<2x128xf32>
    %35 = arith.cmpf oge, %4, %6 : vector<2x128xf32>
    %36 = arith.cmpf oge, %4, %8 : vector<2x128xf32>
    %c0_i32_22 = arith.constant 0 : i32
    %c2_i32 = arith.constant 2 : i32
    %37 = vector.broadcast %c0_i32_22 : i32 to vector<2x128xi32>
    %38 = vector.broadcast %c2_i32 : i32 to vector<2x128xi32>
    %39 = arith.select %36, %37, %38 : vector<2x128xi1>, vector<2x128xi32>
    %40 = arith.cmpf oge, %6, %8 : vector<2x128xf32>
    %c1_i32 = arith.constant 1 : i32
    %c2_i32_23 = arith.constant 2 : i32
    %41 = vector.broadcast %c1_i32 : i32 to vector<2x128xi32>
    %42 = vector.broadcast %c2_i32_23 : i32 to vector<2x128xi32>
    %43 = arith.select %40, %41, %42 : vector<2x128xi1>, vector<2x128xi32>
    %44 = arith.select %35, %39, %43 : vector<2x128xi1>, vector<2x128xi32>
    %45 = arith.cmpf oge, %10, %12 : vector<2x128xf32>
    %46 = arith.cmpf oge, %10, %14 : vector<2x128xf32>
    %c0_i32_24 = arith.constant 0 : i32
    %c2_i32_25 = arith.constant 2 : i32
    %47 = vector.broadcast %c0_i32_24 : i32 to vector<2x128xi32>
    %48 = vector.broadcast %c2_i32_25 : i32 to vector<2x128xi32>
    %49 = arith.select %46, %47, %48 : vector<2x128xi1>, vector<2x128xi32>
    %50 = arith.cmpf oge, %12, %14 : vector<2x128xf32>
    %c1_i32_26 = arith.constant 1 : i32
    %c2_i32_27 = arith.constant 2 : i32
    %51 = vector.broadcast %c1_i32_26 : i32 to vector<2x128xi32>
    %52 = vector.broadcast %c2_i32_27 : i32 to vector<2x128xi32>
    %53 = arith.select %50, %51, %52 : vector<2x128xi1>, vector<2x128xi32>
    %54 = arith.select %45, %49, %53 : vector<2x128xi1>, vector<2x128xi32>
    %c3_i32 = arith.constant 3 : i32
    %55 = vector.broadcast %c3_i32 : i32 to vector<2x128xi32>
    %56 = arith.muli %54, %55 : vector<2x128xi32>
    %57 = arith.addi %56, %44 : vector<2x128xi32>
    %cst = arith.constant 5.000000e-01 : f32
    %58 = vector.broadcast %cst : f32 to vector<2x128xf32>
    %c7_i32 = arith.constant 7 : i32
    %59 = vector.broadcast %c7_i32 : i32 to vector<2x128xi32>
    %60 = arith.cmpi eq, %57, %59 : vector<2x128xi32>
    %cst_28 = arith.constant 3.000000e-01 : f32
    %61 = vector.broadcast %cst_28 : f32 to vector<2x128xf32>
    %62 = arith.select %60, %61, %58 : vector<2x128xi1>, vector<2x128xf32>
    %c6_i32 = arith.constant 6 : i32
    %63 = vector.broadcast %c6_i32 : i32 to vector<2x128xi32>
    %64 = arith.cmpi eq, %57, %63 : vector<2x128xi32>
    %cst_29 = arith.constant 3.000000e+00 : f32
    %65 = vector.broadcast %cst_29 : f32 to vector<2x128xf32>
    %66 = arith.select %64, %65, %62 : vector<2x128xi1>, vector<2x128xf32>
    %c5_i32 = arith.constant 5 : i32
    %67 = vector.broadcast %c5_i32 : i32 to vector<2x128xi32>
    %68 = arith.cmpi eq, %57, %67 : vector<2x128xi32>
    %cst_30 = arith.constant 2.000000e+00 : f32
    %69 = vector.broadcast %cst_30 : f32 to vector<2x128xf32>
    %70 = arith.select %68, %69, %66 : vector<2x128xi1>, vector<2x128xf32>
    %c4_i32 = arith.constant 4 : i32
    %71 = vector.broadcast %c4_i32 : i32 to vector<2x128xi32>
    %72 = arith.cmpi eq, %57, %71 : vector<2x128xi32>
    %cst_31 = arith.constant 1.250000e-01 : f32
    %73 = vector.broadcast %cst_31 : f32 to vector<2x128xf32>
    %74 = arith.select %72, %73, %70 : vector<2x128xi1>, vector<2x128xf32>
    %c3_i32_32 = arith.constant 3 : i32
    %75 = vector.broadcast %c3_i32_32 : i32 to vector<2x128xi32>
    %76 = arith.cmpi eq, %57, %75 : vector<2x128xi32>
    %cst_33 = arith.constant 1.500000e+00 : f32
    %77 = vector.broadcast %cst_33 : f32 to vector<2x128xf32>
    %78 = arith.select %76, %77, %74 : vector<2x128xi1>, vector<2x128xf32>
    %c2_i32_34 = arith.constant 2 : i32
    %79 = vector.broadcast %c2_i32_34 : i32 to vector<2x128xi32>
    %80 = arith.cmpi eq, %57, %79 : vector<2x128xi32>
    %cst_35 = arith.constant 4.500000e+00 : f32
    %81 = vector.broadcast %cst_35 : f32 to vector<2x128xf32>
    %82 = arith.select %80, %81, %78 : vector<2x128xi1>, vector<2x128xf32>
    %c1_i32_36 = arith.constant 1 : i32
    %83 = vector.broadcast %c1_i32_36 : i32 to vector<2x128xi32>
    %84 = arith.cmpi eq, %57, %83 : vector<2x128xi32>
    %cst_37 = arith.constant 2.500000e-01 : f32
    %85 = vector.broadcast %cst_37 : f32 to vector<2x128xf32>
    %86 = arith.select %84, %85, %82 : vector<2x128xi1>, vector<2x128xf32>
    %c0_i32_38 = arith.constant 0 : i32
    %87 = vector.broadcast %c0_i32_38 : i32 to vector<2x128xi32>
    %88 = arith.cmpi eq, %57, %87 : vector<2x128xi32>
    %cst_39 = arith.constant 0.699999988 : f32
    %89 = vector.broadcast %cst_39 : f32 to vector<2x128xf32>
    %90 = arith.select %88, %89, %86 : vector<2x128xi1>, vector<2x128xf32>
    %c0_40 = arith.constant 0 : index
    %c0_41 = arith.constant 0 : index
    %91 = vector.load %arg5[%c0_40, %c0_41] : memref<2x128xf32, #tpu.memory_space<vmem>>, vector<2x128xf32>
    %92 = arith.mulf %34, %90 : vector<2x128xf32>
    %93 = arith.addf %91, %92 : vector<2x128xf32>
    %c0_42 = arith.constant 0 : index
    %c0_43 = arith.constant 0 : index
    %94 = vector.load %arg5[%c0_42, %c0_43] : memref<2x128xf32, #tpu.memory_space<vmem>>, vector<2x128xf32>
    tpu.vector_store %arg5[%c0_42, %c0_43], %93 {strides = array<i32>} : memref<2x128xf32, #tpu.memory_space<vmem>>, vector<2x128xf32>,
    %c0_i32_44 = arith.constant 0 : i32
    %95 = arith.cmpi eq, %arg1, %c0_i32_44 : i32
    %96 = arith.extui %95 : i1 to i32
    %c0_i32_45 = arith.constant 0 : i32
    %97 = arith.cmpi ne, %96, %c0_i32_45 : i32
    scf.if %97 {
      %c0_46 = arith.constant 0 : index
      %c0_47 = arith.constant 0 : index
      %98 = vector.load %arg5[%c0_46, %c0_47] : memref<2x128xf32, #tpu.memory_space<vmem>>, vector<2x128xf32>
      %cst_48 = arith.constant dense<0.000000e+00> : vector<128xf32>
      %99 = vector.multi_reduction <add>, %98, %cst_48 [0] : vector<2x128xf32> to vector<128xf32>
      %100 = vector.shape_cast %99 : vector<128xf32> to vector<1x128xf32>
      %c0_49 = arith.constant 0 : index
      %c0_50 = arith.constant 0 : index
      %c0_51 = arith.constant 0 : index
      %101 = vector.load %arg4[%c0_49, %c0_50, %c0_51] : memref<1x1x128xf32, #tpu.memory_space<vmem>>, vector<1x1x128xf32>
      %102 = vector.shape_cast %101 : vector<1x1x128xf32> to vector<1x128xf32>
      %103 = vector.shape_cast %100 : vector<1x128xf32> to vector<1x1x128xf32>
      tpu.vector_store %arg4[%c0_49, %c0_50, %c0_51], %103 {strides = array<i32>} : memref<1x1x128xf32, #tpu.memory_space<vmem>>, vector<1x1x128xf32>,
    } else {
    }
    return
  }
  func.func @transform_0(%arg0: i32, %arg1: i32) -> (i32, i32, i32, i32) {
    %c0_i32 = arith.constant 0 : i32
    %c0_i32_0 = arith.constant 0 : i32
    %c0_i32_1 = arith.constant 0 : i32
    return %arg0, %c0_i32, %arg1, %c0_i32_0 : i32, i32, i32, i32
  }
  func.func @transform_1(%arg0: i32, %arg1: i32) -> (i32, i32, i32, i32) {
    %c0_i32 = arith.constant 0 : i32
    %c0_i32_0 = arith.constant 0 : i32
    %c0_i32_1 = arith.constant 0 : i32
    return %arg0, %c0_i32, %arg1, %c0_i32_0 : i32, i32, i32, i32
  }
  func.func @transform_2(%arg0: i32, %arg1: i32) -> (i32, i32, i32) {
    %c0_i32 = arith.constant 0 : i32
    %c0_i32_0 = arith.constant 0 : i32
    %c0_i32_1 = arith.constant 0 : i32
    return %arg0, %c0_i32, %c0_i32_0 : i32, i32, i32
  }
}

</mosaic_0001>

<bundles_post_ra>
// kernel: tpu_custom_call.1
= control target key start
LH: loop header
LB: loop body
LE: loop exit
PB: predicated region body
PF: predicated region fallthrough
CT: control target
= control target key end

     0   :  { %7 = vsyncpa [#allocation4], 0  ;;  %s831_s0 = inlined_call_operand.hbm [shape: f32[2,3,2,128], index: 0, kind: input, shape index: {}]   ;;  %s832_s1 = inlined_call_operand.hbm [shape: f32[2,3,2,128], index: 1, kind: input, shape index: {}]   ;;  %s833_s2 = inlined_call_operand.hbm [shape: f32[2,1,128], index: 2, kind: output, shape index: {}]  }
   0x1   :  { %9 = vsyncpa [#allocation4 + $0x1], 0 }
   0x2   :  { %10 = vsyncpa [#allocation7], 0 }
   0x3   :  { %12 = vsyncpa [#allocation7 + $0x1], 0 }
   0x4   :  { %13 = vsyncpa [#allocation5], 0 }
   0x5   :  { %15 = vsyncpa [#allocation5 + $0x1], 0  ;;  %s689_s9 = smov 0   ;;  %s691_s10 = smov 0  }
   0x6   :  { %s693_s11 = smov 0   ;;  %s695_s12 = smov 0  }
   0x7   :  { %s697_s13 = smov 0   ;;  %s699_s14 = smov 0  }
   0x8 LB: > { %s423_s15 = sadd.s32 4294967295, %s667_s14   ;;  %s424_s16 = sadd.s32 4294967294, %s667_s14   ;;  %s667_s14 = sphi %s699_s14, %s21_s14   ;;  %s663_s13 = sphi %s697_s13, %s843_s13   ;;  %s659_s12 = sphi %s695_s12, %s842_s12   ;;  %s655_s11 = sphi %s693_s11, %s841_s11   ;;  %s651_s10 = sphi %s691_s10, %s840_s10   ;;  %s647_s9 = sphi %s689_s9, %s839_s9  }
   0x9   : > { %s33_s17 = sadd.s32 1, %s663_s13  ;;  %s42_s18 = sadd.s32 1, %s655_s11 }
   0xa   : > { %p35_p0 = scmp.ge.s32.totalorder %s33_s17, 2  ;;  %p49_p1 = scmp.ne.s32.totalorder %s655_s11, %s651_s10 }
   0xb   : > { %p50_p2 = scmp.eq.s32.totalorder %s667_s14, 0  ;;  %p55_p3 = scmp.ne.s32.totalorder %s651_s10, %s647_s9 }
   0xc   : > { %s845_s17 = smov (%p35_p0, %s33_s17), 0  ;;  %p56_p5 = scmp.eq.s32.totalorder %s423_s15, 0 }
   0xd   : > { %p730_p4 = por %p50_p2, %p49_p1  ;;  %s37_s20 = ssub.s32 %s663_s13, %s845_s17 }
   0xe   : > { %p107_p6 = scmp.eq.s32.totalorder %s423_s15, 1  ;;  %p40_p7 = scmp.eq.s32.totalorder %s37_s20, 0 }
   0xf   : > { %p736_p8 = por %p56_p5, %p55_p3  ;;  %p113_p10 = scmp.eq.s32.totalorder %s424_s16, 1 }
  0x10   : > { %p740_p9 = por %p107_p6, %p49_p1  ;;  %p426_p12 = scmp.ge.s32.totalorder %s667_s14, 2 }
  0x11   : > { %s745_s23 = scalar_select %p40_p7, %s655_s11, %s42_s18  }
  0x12   : > { %p747_p11 = por %p113_p10, %p55_p3  ;;  %p458_p13 = scmp.lt.s32.totalorder %s667_s14, 2 }
  0x13   : > { %s754_s25 = sand.u32 1, %s655_s11   ;;  %s437_s27 = smul.u32 6, %s663_s13 }
  0x14   : > { %s436_s26 = smul.u32 6, %s754_s25  ;;  %p760_p0 = pnand %p458_p13, %p730_p4 }
  0x15   : > { %s143_s3 = scalar_lea.hbm %s831_s0, %s437_s27  ;;  %p429_p1 = scmp.ge.s32.totalorder %s667_s14, 1 }
  0x16   : > { %s137_s4 = scalar_lea.vmem [#allocation3], %s436_s26  ;;  %s144_s6 = sshll.u32 %s143_s3, 4  ;;  %s145_s6 = int_to_ptr.hbm [resolvable:$true] %s144_s6 }
  0x17   : > { %s146_s5 = sshll.u32 %s137_s4, 4  ;;  %s134_s7 = scalar_lea.sflag [#allocation4], %s754_s25  ;;  %s147_s5 = int_to_ptr.vmem [resolvable:$true] %s146_s5 }
  0x18   : > { %s669_s8 = smov 32   ;;  %s670_s15 = smov 2  }
  0x19   : > { %450 = dma.hbm_to_vmem [thread:$0]  (!%p760_p0), %s145_s6, 96, %s147_s5, %s134_s7, %s669_s8, %s669_s8, %s670_s15  }
  0x1a   : > { %p177_p2 = scmp.lt.s32.totalorder %s667_s14, 3  ;;  %s166_s19 = scalar_lea.hbm %s832_s1, %s437_s27 }
  0x1b   : > { %s167_s20 = sshll.u32 %s166_s19, 4  ;;  %s160_s29 = scalar_lea.vmem [#allocation6], %s436_s26  ;;  %s168_s20 = int_to_ptr.hbm [resolvable:$true] %s167_s20 }
  0x1c   : > { %p178_p3 = pnand %p429_p1, %p177_p2  ;;  %s169_s30 = sshll.u32 %s160_s29, 4  ;;  %s170_s30 = int_to_ptr.vmem [resolvable:$true] %s169_s30 }
  0x1d   : > { %s157_s3 = scalar_lea.sflag [#allocation7], %s754_s25  ;;  %s779_s4 = sand.u32 (!%p178_p3), 1, %s651_s10  }
  0x1e   : > { %453 = dma.hbm_to_vmem [thread:$0]  (!%p760_p0), %s168_s20, 96, %s170_s30, %s157_s3, %s669_s8, %s669_s8, %s670_s15  }
  0x1f   : > { %181 = sbr.rel (%p178_p3) target bundleno = 101 (0x65), region = 28  ;;  %s184_s6 = scalar_lea.sflag (!%p178_p3), [#allocation4], %s779_s4 }
  0x20   : > { %s440_s5 = smul.u32 (!%p178_p3), 6, %s779_s4 }
  0x22   : > { %s187_s7 = scalar_lea.vmem (!%p178_p3), [#allocation3], %s440_s5 }
  0x24   : > { %634 = dma.done.wait (%p736_p8), %s184_s6, 96  }
  0x25   : > { %636 = vsyncadd (%p736_p8), %s184_s6, 4294967200  ;;  %s194_s25 = scalar_lea.sflag [#allocation7], %s779_s4  ;;  %s197_s26 = scalar_lea.vmem [#allocation6], %s440_s5 }
  0x26   : > { %638 = dma.done.wait (%p736_p8), %s194_s25, 96  }
  0x27   : > { %640 = vsyncadd (%p736_p8), %s194_s25, 4294967200  ;;  %v671_v0 = vmov 0.0   ;;  %v228_v1 = vld [vmem:[%s187_s7] sm:$0x3]  ;;  %v430_v2 = vld [vmem:[%s187_s7 + $0x2] sm:$0x3]  ;;  %s318_s28 = scalar_lea.hbm %s833_s2, %s659_s12 }
  0x28   : > { %227 = vst [vmem:[#allocation2] sm:$0x3] %v671_v0  ;;  %v431_v3 = vld [vmem:[%s187_s7 + $0x4] sm:$0x3]  ;;  %v233_v4 = vld [vmem:[%s197_s26] sm:$0x3]  ;;  %v238_v7 = vmax.f32 %v228_v1, %v430_v2  ;;  %vm262_vm0 = vcmp.ge.f32.partialorder %v228_v1, %v430_v2 }
  0x29   : > { %v432_v5 = vld [vmem:[%s197_s26 + $0x2] sm:$0x3]  ;;  %v433_v6 = vld [vmem:[%s197_s26 + $0x4] sm:$0x3]  ;;  %vm263_vm1 = vcmp.ge.f32.partialorder %v228_v1, %v431_v3  ;;  %vm265_vm2 = vcmp.ge.f32.partialorder %v430_v2, %v431_v3  ;;  %v672_v8 = vmov 2   ;;  %v673_v24 = vmov 0.5  }
  0x2a   : > { %v264_v9 = vsel %vm263_vm1, 0, %v672_v8  ;;  %v266_v10 = vsel %vm265_vm2, 1, %v672_v8  ;;  %vm268_vm3 = vcmp.ge.f32.partialorder %v233_v4, %v432_v5  ;;  %v239_v11 = vmax.f32 %v238_v7, %v431_v3  ;;  %s222_s8 = scalar_lea.vmem [#allocation8], %s779_s4  ;;  %s322_s16 = sshll.u32 %s318_s28, 4  ;;  %s323_s16 = int_to_ptr.hbm [resolvable:$true] %s322_s16 }
  0x2b   : > { %vm269_vm4 = vcmp.ge.f32.partialorder %v233_v4, %v433_v6  ;;  %vm271_vm5 = vcmp.ge.f32.partialorder %v432_v5, %v433_v6  ;;  %v267_v12 = vsel %vm262_vm0, %v264_v9, %v266_v10  ;;  %v253_v36 = vadd.f32 %v432_v5, %v233_v4  ;;  %s320_s15 = sshll.u32 %s222_s8, 4  ;;  %s310_s18 = scalar_lea.sflag [#allocation5], %s779_s4  ;;  %s321_s15 = int_to_ptr.vmem [resolvable:$true] %s320_s15 }
  0x2c   : > { %v270_v13 = vsel %vm269_vm4, 0, %v672_v8  ;;  %v272_v14 = vsel %vm271_vm5, 1, %v672_v8  ;;  %v240_v15 = vsub.f32 %v228_v1, %v239_v11  ;;  %v241_v16 = vsub.f32 %v430_v2, %v239_v11  ;;  %s595_s19 = sshra.s32 %s323_s16, 4  ;;  %s601_s12 = scalar_lea.hbm %s833_s2, 2  ;;  %s596_s19 = int_to_ptr.hbm [resolvable:$true] %s595_s19 }
  0x2d   : > { %v242_v17 = vsub.f32 %v431_v3, %v239_v11  ;;  %v273_v18 = vsel %vm268_vm3, %v270_v13, %v272_v14  ;;  %v254_v41 = vadd.f32 %v433_v6, %v253_v36  ;;  %vm300_vm14 = vcmask 1041408   ;;  %s597_s20 = scalar_lea.hbm %s596_s19, 1  ;;  %p602_p7 = scmp.lt.s32.totalorder %s596_s19, %s833_s2 }
  0x2e   : > { %v274_v19 = vmul.u32 3, %v273_v18  ;;  %v243_v20 = vmul.f32 1.442695, %v240_v15  ;;  %v245_v21 = vmul.f32 1.442695, %v241_v16  ;;  %v256_v34 = vmul.f32 %v240_v15, %v233_v4  ;;  %p598_p4 = scmp.ne.s32.totalorder %s596_s19, %s597_s20  ;;  %p603_p8 = scmp.lt.s32.totalorder %s601_s12, %s597_s20 }
  0x2f   : > { %v248_v22 = vmul.f32 1.442695, %v242_v17  ;;  %v257_v35 = vmul.f32 %v432_v5, %v241_v16  ;;  %v259_v39 = vmul.f32 %v433_v6, %v242_v17  ;;  %v292_v49 = vld [vmem:[#allocation2] sm:$0x3] }
  0x30   : > { %v275_v23 = vadd.s32 %v274_v19, %v267_v12  ;;  %513 = vpow2.f32 %v243_v20  ;;  %p599_p5 = pnand %p598_p4, %p740_p9  ;;  %p604_p10 = por %p603_p8, %p602_p7 }
  0x31   : > { %515 = vpow2.f32 %v245_v21  ;;  %v258_v38 = vadd.f32 %v257_v35, %v256_v34 }
  0x32   : > { %vm276_vm6 = vcmp.eq.s32.totalorder %v275_v23, 7  ;;  %vm278_vm7 = vcmp.eq.s32.totalorder %v275_v23, 6  ;;  %517 = vpow2.f32 %v248_v22  ;;  %vm280_vm8 = vcmp.eq.s32.totalorder %v275_v23, 5  ;;  %p600_p6 = pneg %p599_p5 }
  0x33   : > { %v277_v25 = vsel %vm276_vm6, 0.3, %v673_v24  ;;  %vm282_vm9 = vcmp.eq.s32.totalorder %v275_v23, 4  ;;  %vm284_vm10 = vcmp.eq.s32.totalorder %v275_v23, 3  ;;  %vm286_vm11 = vcmp.eq.s32.totalorder %v275_v23, 2 }
  0x34   : > { %v279_v26 = vsel %vm278_vm7, 3.0, %v277_v25  ;;  %vm288_vm12 = vcmp.eq.s32.totalorder %v275_v23, 1  ;;  %v260_v44 = vadd.f32 %v259_v39, %v258_v38  ;;  %vm290_vm13 = vcmp.eq.s32.totalorder %v275_v23, 0  ;;  %p605_p13 = pnand %p604_p10, %p600_p6 }
  0x35   : > { %v281_v29 = vsel %vm280_vm8, 2.0, %v279_v26 }
  0x36   : > { %v514_v27 = vpop.eup %513  ;;  %v283_v33 = vsel %vm282_vm9, 0.125, %v281_v29 }
  0x37   : > { %v516_v28 = vpop.eup %515  ;;  %v285_v37 = vsel %vm284_vm10, 1.5, %v283_v33 }
  0x38   : > { %v518_v30 = vpop.eup %517  ;;  %v247_v31 = vadd.f32 %v516_v28, %v514_v27  ;;  %v287_v40 = vsel %vm286_vm11, 4.5, %v285_v37 }
  0x39   : > { %v289_v45 = vsel %vm288_vm12, 0.25, %v287_v40 }
  0x3a   : > { %v250_v32 = vadd.f32 %v518_v30, %v247_v31  ;;  %v291_v47 = vsel %vm290_vm13, 0.7, %v289_v45 }
  0x3c   : > { %519 = vlog2.f32 %v250_v32 }
  0x42   : > { %v520_v42 = vpop.eup %519 }
  0x43   : > { %v252_v43 = vmul.f32 0.6931472, %v520_v42 }
  0x45   : > { %v255_v46 = vmul.f32 %v254_v41, %v252_v43 }
  0x47   : > { %v261_v48 = vsub.f32 %v255_v46, %v260_v44 }
  0x49   : > { %v293_v50 = vmul.f32 %v291_v47, %v261_v48 }
  0x4b   : > { %v294_v51 = vadd.f32 %v293_v50, %v292_v49 }
  0x4d   : > { %295 = vst [vmem:[#allocation2] sm:$0x3] %v294_v51 }
  0x54   : > { %v299_v52 = vld [vmem:[#allocation2] sm:$0x3] }
  0x55   : > { %v301_v53 = vsel %vm300_vm14, %v299_v52, 0.0 }
  0x56   : > { %v302_v54 = vrot.slane %v301_v53, 4 }
  0x58   : > { %v303_v55 = vadd.f32 %v302_v54, %v301_v53 }
  0x5a   : > { %v304_v56 = vrot.slane %v303_v55, 2 }
  0x5c   : > { %v305_v57 = vadd.f32 %v304_v56, %v303_v55 }
  0x5e   : > { %v306_v58 = vrot.slane %v305_v57, 1 }
  0x60   : > { %v307_v59 = vadd.f32 %v306_v58, %v305_v57 }
  0x62   : > { %308 = vst [vmem:[%s222_s8] sm:$0x1] %v307_v59 }
  0x63   : > { %608 = shalt.err (!%p605_p13)
}
  0x64   : > { %445 = dma.vmem_to_hbm [thread:$0]  (%p740_p9), %s321_s15, 16, %s323_s16, %s310_s18  }
  0x65 PF: > { %s334_s4 = sand.u32 1, %s647_s9   ;;  %p455_p0 = pnand %p426_p12, %p747_p11 }
  0x66   : > { %s335_s6 = scalar_lea.sflag [#allocation5], %s334_s4 }
  0x67   : > { %p456_p1 = pneg %p455_p0 }
  0x69   : > { %642 = dma.done.wait (%p456_p1), %s335_s6, 16  }
  0x6a   : > { %644 = vsyncadd (%p456_p1), %s335_s6, 4294967280  ;;  %s21_s14 = sadd.s32 1, %s667_s14   ;;  %s839_s9 = smov %s651_s10 }
  0x6b   : > { %p18_p2 = scmp.ge.s32.totalorder %s21_s14, 4   ;;  %s840_s10 = smov %s655_s11 }
  0x6c   : > { %s841_s11 = smov %s745_s23  ;;  %s842_s12 = smov %s663_s13 }
  0x6d   : > { %s843_s13 = smov %s845_s17  ;;  %20 = sbr.rel (!%p18_p2) target bundleno = 8 (0x8), region = 98 }
  0x72   :  { %340 = vsyncpa [#allocation4], 1 }
  0x73   :  { %342 = vsyncpa [#allocation4 + $0x1], 1 }
  0x74   :  { %343 = vsyncpa [#allocation7], 1 }
  0x75   :  { %345 = vsyncpa [#allocation7 + $0x1], 1 }
  0x76   :  { %346 = vsyncpa [#allocation5], 1 }
  0x77   :  { %348 = vsyncpa [#allocation5 + $0x1], 1 }

</bundles_post_ra>
